<compile_context>
chip_gen: v5e
topology: v5e:2x2
jax: 0.10.0
libtpu: 0.0.40
codegen_flags: <defaults>
</compile_context>

<pallas_src>
import math

import jax
import jax.numpy as jnp
from jax.experimental import pallas as pl
from jax.experimental.pallas import tpu as pltpu

LANE = 128


def gcn_adj_kernel(adj_ref, s_ref, b_ref, o_ref):
    """Grid: (N row tiles,).

    adj_ref: (tm, N)   bf16  adjacency row tile (streamed once)
    s_ref:   (N, L)    bf16  resident folded support  S = [N, B*T*F_out]
    b_ref:   (1, L)    f32   resident bias, tiled across graphs
    o_ref:   (tm, L)   f32   output row tile (lane-dense, unmasked stores)
    """
    acc = jnp.dot(adj_ref[...], s_ref[...], preferred_element_type=jnp.float32)
    o_ref[...] = acc + b_ref[...]


def _vmem_limit_bytes():
    # v7x has 64 MiB VMEM/TC -> ~54 MiB limit; v5e/v6e have 128 MiB -> 100 MiB.
    try:
        info = pltpu.get_tpu_info()
        phys = getattr(info, "vmem_capacity_bytes", 64 * 1024 * 1024)
    except Exception:
        phys = 64 * 1024 * 1024
    return min(int(phys * 0.85), 100 * 1024 * 1024)


def _pick_row_tile(N, L, vmem_limit):
    """Largest adjacency row tile (multiple of 8) that fits the VMEM budget."""
    budget = int(vmem_limit * 0.75)
    # resident S (count 2x for safety) + bias  +  double-buffered adj/out tiles
    fixed = 2 * N * L * 2 + 2 * L * 4
    per_row = 2 * (N * 2 + L * 4)
    avail = budget - fixed
    tm = 8 if avail <= per_row * 8 else int(avail // per_row)
    tm = min(tm, 2048)
    if tm >= N:
        return N
    return max(8, (tm // 8) * 8)


def spatial_processor_gcn(x, adj, weight, bias):
    """x: [B, T, N, D] f32, adj: [N, N] f32 (already normalized),
    weight: [D, D] f32, bias: [D] f32 -> [B, T, N, D] f32."""
    B, T, N, D = x.shape
    BT = B * T
    f_in, f_out = weight.shape
    assert D == f_in

    # Hoisted support = x @ W for all B*T graphs, lane-folded layout:
    #   S[n, b*F_out + f] = sum_d x[b, n, d] * W[d, f]
    xb = x.reshape(BT, N, f_in)
    support = jnp.einsum("bnd,df->nbf", xb, weight,
                         preferred_element_type=jnp.float32)
    L = BT * f_out
    S = support.reshape(N, L)

    # Bias broadcast across the folded lane dim (repeats once per graph).
    bias_tiled = jnp.tile(bias.astype(jnp.float32), BT)

    # Pad the folded lane dim only if it is not already a multiple of 128
    # (for the default shapes L = 256 -> no padding at all).
    L_p = pl.cdiv(L, LANE) * LANE
    if L_p != L:
        S = jnp.pad(S, ((0, 0), (0, L_p - L)))
        bias_tiled = jnp.pad(bias_tiled, (0, L_p - L))
    S = S.astype(jnp.bfloat16)
    bias_tiled = bias_tiled.reshape(1, L_p)
    adj_b = adj.astype(jnp.bfloat16)

    vmem_limit = _vmem_limit_bytes()
    tm = _pick_row_tile(N, L_p, vmem_limit)
    n_row = pl.cdiv(N, tm)

    out = pl.pallas_call(
        gcn_adj_kernel,
        out_shape=jax.ShapeDtypeStruct((N, L_p), jnp.float32),
        grid_spec=pltpu.PrefetchScalarGridSpec(
            num_scalar_prefetch=0,
            grid=(n_row,),
            in_specs=[
                # adjacency row tile: the only streamed operand, read once
                pl.BlockSpec((tm, N), lambda i: (i, 0)),
                # folded support: resident (constant index -> no per-step DMA)
                pl.BlockSpec((N, L_p), lambda i: (0, 0)),
                # bias: resident
                pl.BlockSpec((1, L_p), lambda i: (0, 0)),
            ],
            out_specs=pl.BlockSpec((tm, L_p), lambda i: (i, 0)),
        ),
        compiler_params=pltpu.CompilerParams(
            # no cross-step dependency -> row-tile axis fully parallel
            dimension_semantics=("parallel",),
            vmem_limit_bytes=vmem_limit,
        ),
    )(adj_b, S, bias_tiled)

    if L_p != L:
        out = out[:, :L]
    # [N, BT, F_out] -> [BT, N, F_out] -> [B, T, N, F_out]
    return out.reshape(N, BT, f_out).transpose(1, 0, 2).reshape(B, T, N, f_out)


def normalize_adj(adj_matrix, num_nodes):
    # Mirrors the PyTorch buffer:  D^{-1/2} (A + I) D^{-1/2}
    a_hat = adj_matrix + jnp.eye(num_nodes, dtype=adj_matrix.dtype)
    d_inv_sqrt = 1.0 / jnp.sqrt(jnp.sum(a_hat, axis=1))
    d = jnp.diag(d_inv_sqrt)
    return d @ a_hat @ d


def init_params(key, in_features, out_features):
    # nn.init.kaiming_uniform_ (a=0, leaky_relu): gain=sqrt(2),
    # fan_in = weight.size(1) = out_features, bound = gain*sqrt(3/fan_in)
    fan_in = out_features
    bound = math.sqrt(2.0) * math.sqrt(3.0 / fan_in)
    weight = jax.random.uniform(
        key, (in_features, out_features), jnp.float32, minval=-bound, maxval=bound
    )
    bias = jnp.zeros((out_features,), jnp.float32)  # nn.init.zeros_
    return weight, bias


if __name__ == "__main__":
    key = jax.random.PRNGKey(0)
    k_x, k_adj, k_w = jax.random.split(key, 3)

    # [B, T, N, D] with mid_dim = D, num_nodes = N
    B, T, N, D = 2, 4, 16, 32

    x = jax.random.normal(k_x, (B, T, N, D), jnp.float32)

    # symmetric 0/1 adjacency (no self loops); normalization adds I
    a = (jax.random.uniform(k_adj, (N, N)) > 0.5).astype(jnp.float32)
    a = jnp.triu(a, 1)
    adj_raw = a + a.T
    adj = normalize_adj(adj_raw, N)

    weight, bias = init_params(k_w, D, D)

    out = spatial_processor_gcn(x, adj, weight, bias)
    jax.block_until_ready(out)

    # Reference: plain-JAX f32 (highest precision) of the PyTorch forward.
    xb = x.reshape(B * T, N, D)
    support = jnp.einsum("bnd,de->bne", xb, weight,
                         precision=jax.lax.Precision.HIGHEST)
    ref = jnp.einsum("nm,bme->bne", adj, support,
                     precision=jax.lax.Precision.HIGHEST) + bias[None, None, :]
    ref = ref.reshape(B, T, N, D)

    assert out.shape == (B, T, N, D)
    # bf16 MXU inputs with f32 accumulation -> bf16-level tolerance
    assert jnp.allclose(out, ref, atol=5e-2, rtol=5e-2), float(
        jnp.max(jnp.abs(out - ref))
    )

    print("KERNEL_OK")
</pallas_src>

<mosaic_0001>
module attributes {stable_mosaic.version = 11 : i64} {
  func.func @gcn_adj_kernel(%arg0: i32, %arg1: memref<16x16xbf16, #tpu.memory_space<vmem>>, %arg2: memref<16x256xbf16, #tpu.memory_space<vmem>>, %arg3: memref<1x256xf32, #tpu.memory_space<vmem>>, %arg4: memref<16x256xf32, #tpu.memory_space<vmem>>) attributes {dimension_semantics = [#tpu.dimension_semantics<parallel>], iteration_bounds = array<i64: 1>, scalar_prefetch = 0 : i64, scratch_operands = 0 : i64, tpu.core_type = #tpu.core_type<tc>, window_params = [{transform_indices = @transform_0, window_bounds = array<i64: 16, 16>}, {pipeline_mode = #tpu.pipeline_mode<synchronous>, transform_indices = @transform_1, window_bounds = array<i64: 16, 256>}, {pipeline_mode = #tpu.pipeline_mode<synchronous>, transform_indices = @transform_2, window_bounds = array<i64: 1, 256>}, {transform_indices = @transform_3, window_bounds = array<i64: 16, 256>}]} {
    %c0 = arith.constant 0 : index
    %c0_0 = arith.constant 0 : index
    %0 = vector.load %arg1[%c0, %c0_0] : memref<16x16xbf16, #tpu.memory_space<vmem>>, vector<16x16xbf16>
    %c0_1 = arith.constant 0 : index
    %c0_2 = arith.constant 0 : index
    %1 = vector.load %arg2[%c0_1, %c0_2] : memref<16x256xbf16, #tpu.memory_space<vmem>>, vector<16x256xbf16>
    %cst = arith.constant dense<0.000000e+00> : vector<16x256xf32>
    %2 = tpu.matmul %0, %1, %cst {dimension_numbers = #tpu.dot_dimension_numbers<[1], [0], [0], [1], [0, 0, 1, 1], [], []>} : vector<16x16xbf16>, vector<16x256xbf16>, vector<16x256xf32> -> vector<16x256xf32>
    %c0_3 = arith.constant 0 : index
    %c0_4 = arith.constant 0 : index
    %3 = vector.load %arg3[%c0_3, %c0_4] : memref<1x256xf32, #tpu.memory_space<vmem>>, vector<1x256xf32>
    %4 = vector.broadcast %3 : vector<1x256xf32> to vector<16x256xf32>
    %5 = arith.addf %2, %4 : vector<16x256xf32>
    %c0_5 = arith.constant 0 : index
    %c0_6 = arith.constant 0 : index
    %6 = vector.load %arg4[%c0_5, %c0_6] : memref<16x256xf32, #tpu.memory_space<vmem>>, vector<16x256xf32>
    tpu.vector_store %arg4[%c0_5, %c0_6], %5 {strides = array<i32>} : memref<16x256xf32, #tpu.memory_space<vmem>>, vector<16x256xf32>,
    return
  }
  func.func @transform_0(%arg0: i32) -> (i32, i32) {
    %c0_i32 = arith.constant 0 : i32
    %c0_i32_0 = arith.constant 0 : i32
    return %arg0, %c0_i32 : i32, i32
  }
  func.func @transform_1(%arg0: i32) -> (i32, i32) {
    %c0_i32 = arith.constant 0 : i32
    %c0_i32_0 = arith.constant 0 : i32
    %c0_i32_1 = arith.constant 0 : i32
    return %c0_i32, %c0_i32_0 : i32, i32
  }
  func.func @transform_2(%arg0: i32) -> (i32, i32) {
    %c0_i32 = arith.constant 0 : i32
    %c0_i32_0 = arith.constant 0 : i32
    %c0_i32_1 = arith.constant 0 : i32
    return %c0_i32, %c0_i32_0 : i32, i32
  }
  func.func @transform_3(%arg0: i32) -> (i32, i32) {
    %c0_i32 = arith.constant 0 : i32
    %c0_i32_0 = arith.constant 0 : i32
    return %arg0, %c0_i32 : i32, i32
  }
}

</mosaic_0001>

<bundles_post_ra>
// kernel: tpu_custom_call.1
= control target key start
LH: loop header
LB: loop body
LE: loop exit
PB: predicated region body
PF: predicated region fallthrough
CT: control target
= control target key end

     0   :  { %8 = vsyncpa [#allocation3], 0  ;;  %s313_s0 = inlined_call_operand.hbm [shape: bf16[16,16], index: 0, kind: input, shape index: {}]   ;;  %s314_s1 = inlined_call_operand.hbm [shape: bf16[16,256], index: 1, kind: input, shape index: {}]   ;;  %s315_s2 = inlined_call_operand.hbm [shape: f32[1,256], index: 2, kind: input, shape index: {}]   ;;  %s316_s3 = inlined_call_operand.hbm [shape: f32[16,256], index: 3, kind: output, shape index: {}]  }
   0x1   :  { %9 = vsyncpa [#allocation6], 0  ;;  %s28_s14 = sshll.u32 %s314_s1, 4  ;;  %s29_s14 = int_to_ptr.hbm [resolvable:$true] %s28_s14 }
   0x2   :  { %10 = vsyncpa [#allocation4], 0  ;;  %s271_s15 = smov [#allocation5]   ;;  %s15_s19 = sshll.u32 %s313_s0, 4  ;;  %s16_s19 = int_to_ptr.hbm [resolvable:$true] %s15_s19 }
   0x3   :  { %s30_s16 = sshll.u32 %s271_s15, 4  ;;  %s272_s20 = smov 128   ;;  %s31_s16 = int_to_ptr.vmem [resolvable:$true] %s30_s16 }
   0x4   :  { %s273_s21 = smov 8   ;;  %s274_s22 = smov [#allocation2]  }
   0x5   :  { %36 = dma.hbm_to_vmem [thread:$0]  %s29_s14, 256, %s31_s16, [#allocation6], %s272_s20, %s272_s20, %s273_s21  }
   0x6   :  { %s17_s23 = sshll.u32 %s274_s22, 4  ;;  %s275_s24 = smov 64   ;;  %s18_s23 = int_to_ptr.vmem [resolvable:$true] %s17_s23 }
   0x7   :  { %s276_s25 = smov 4   ;;  %s42_s27 = sshll.u32 %s315_s2, 4  ;;  %s43_s27 = int_to_ptr.hbm [resolvable:$true] %s42_s27 }
   0x8   :  { %23 = dma.hbm_to_vmem [thread:$0]  %s16_s19, 128, %s18_s23, [#allocation3], %s275_s24, %s275_s24, %s276_s25  }
   0x9   :  { %s277_s28 = smov [#allocation7]  }
   0xa   :  { %s44_s29 = sshll.u32 %s277_s28, 4  ;;  %s45_s29 = int_to_ptr.vmem [resolvable:$true] %s44_s29 }
   0xb   :  { %47 = dma.hbm_to_vmem [thread:$0]  %s43_s27, 32, %s45_s29, [#allocation6]  }
   0xc   :  { %265 = dma.done.wait [#allocation3], 128  }
   0xd   :  { %266 = vsyncadd [#allocation3], 4294967168 }
   0xe   :  { %267 = dma.done.wait [#allocation6], 288  }
   0xf   :  { %268 = vsyncadd [#allocation6], 4294967008  ;;  %v148_v0 = vld [vmem:[#allocation5] sm:$0xf]  ;;  %v158_v1 = vld [vmem:[#allocation5 + $0x4] sm:$0xf0] }
  0x10   :  { %v157_v2 = vld [vmem:[#allocation5 + $0x4] sm:$0xf]  ;;  %v149_v3 = vor.u32 %v158_v1, %v148_v0  ;;  %v150_v4 = vld [vmem:[#allocation5 + $0x8] sm:$0xf0]  ;;  %v156_v6 = vld [vmem:[#allocation2] sm:$0xff]  ;;  %vm86_vm0 = vcmask 130048  }
  0x11   :  { %v153_v5 = vor.u32 %v157_v2, %v150_v4  ;;  %v65_v7 = vld [vmem:[#allocation7] sm:$0x3]  ;;  %s278_s0 = smov [#allocation8]   ;;  %s128_s5 = sshll.u32 %s316_s3, 4  ;;  %s129_s5 = int_to_ptr.hbm [resolvable:$true] %s128_s5 }
  0x12   :  { %97 = vmatpush.bf16.msra.mxu0 %v149_v3  ;;  %v67_v8 = vperm.slane %v65_v7, 0  ;;  %v68_v9 = vperm.slane %v65_v7, 1  ;;  %s126_s2 = sshll.u32 %s278_s0, 4  ;;  %s279_s6 = smov 256   ;;  %s127_s2 = int_to_ptr.vmem [resolvable:$true] %s126_s2 }
  0x13   :  { %111 = vmatpush.bf16.msra.mxu1 %v153_v5  ;;  %s280_s7 = smov 16  }
  0x15   :  { %154 = vmatmul.msk.bf16.vlgmr.msra.gmra.mxu0 %vm86_vm0, %v156_v6 }
  0x16   :  { %155 = vmatmul.msk.bf16.vlgmr.msra.gmra.mxu1 %vm86_vm0, %v156_v6 }
  0x92   :  { %v99_v10 = vpop.f32.mrf.mxu0 }
  0x93   :  { %v100_v11 = vadd.f32 %v99_v10, %v67_v8  ;;  %v113_v12 = vpop.f32.mrf.mxu1 }
  0x94   :  { %v114_v13 = vadd.f32 %v113_v12, %v68_v9 }
  0x95   :  { %118 = vst [vmem:[#allocation8] sm:$0xff] %v100_v11 }
  0x96   :  { %119 = vst [vmem:[#allocation8 + $0x8] sm:$0xff] %v114_v13 }
  0x9a   :  { %v101_v14 = vpop.f32.mrf.mxu0 }
  0x9b   :  { %v102_v15 = vadd.f32 %v101_v14, %v67_v8  ;;  %v115_v16 = vpop.f32.mrf.mxu1 }
  0x9c   :  { %v116_v17 = vadd.f32 %v115_v16, %v68_v9 }
  0x9d   :  { %120 = vst [vmem:[#allocation8 + $0x10] sm:$0xff] %v102_v15 }
  0x9e   :  { %121 = vst [vmem:[#allocation8 + $0x18] sm:$0xff] %v116_v17 }
  0x9f   :  { %134 = dma.vmem_to_hbm [thread:$0]  %s127_s2, 512, %s129_s5, [#allocation4], %s279_s6, %s279_s6, %s280_s7  }
  0xa0   :  { %269 = dma.done.wait [#allocation4], 512  }
  0xa1   :  { %270 = vsyncadd [#allocation4], 4294966784 }
  0xa2   :  { %139 = vsyncpa [#allocation3], 1 }
  0xa3   :  { %140 = vsyncpa [#allocation6], 1 }
  0xa4   :  { %141 = vsyncpa [#allocation4], 1 }

</bundles_post_ra>
